<compile_context>
chip_gen: v6e
topology: v6e:2x2x1
jax: 0.10.0
libtpu: 0.0.40
codegen_flags: <defaults>
</compile_context>

<pallas_src>
import functools

import jax
import jax.numpy as jnp
from jax import lax
from jax.experimental import pallas as pl
from jax.experimental.pallas import tpu as pltpu


def _round_up(x, m):
    return (x + m - 1) // m * m


def _vmem_limit_bytes():
    """Generation-aware scoped-VMEM budget (v5e/v6e: 128 MiB, v7x: 64 MiB physical)."""
    try:
        cap = int(pltpu.get_tpu_info().vmem_capacity_bytes)
    except Exception:
        cap = 64 * 1024 * 1024
    return max(32 * 1024 * 1024, (cap * 3) // 4)


def _tile_vmem_estimate(TH, H, W, Cin, Cs_p, n_cols, Cout_p, cbytes):
    """Rough per-grid-step VMEM footprint (bytes) for a row tile of TH rows."""
    wp = _round_up(W, 8)
    m = _round_up(TH * W, 8)
    x_blk = 2 * (H + 2) * wp * _round_up(Cin, 128) * cbytes   # resident image, 2 bufs
    s_vals = (TH + 2) * wp * Cs_p * (4 + 4 * cbytes)          # squeeze act + shifted copies
    acc = m * (n_cols + Cout_p) * 4                           # f32 accumulators
    out_blk = 2 * m * Cout_p * 4                              # double-buffered output
    wts = 2 * (3 * 3 * Cs_p * n_cols + Cs_p * n_cols) * cbytes
    return x_blk + s_vals + acc + out_blk + wts


def _pick_tile_rows(H, W, Cin, Cs_p, n_cols, Cout_p, cbytes, budget):
    """Largest divisor of H with <=512 output rows per tile that fits the VMEM budget."""
    cands = [th for th in range(1, H + 1)
             if H % th == 0 and ((th * W) % 8 == 0 or th == H) and th * W <= 512]
    if not cands:
        return H                        # full-height tile is always layout-legal
    fitting = [th for th in cands
               if _tile_vmem_estimate(th, H, W, Cin, Cs_p, n_cols, Cout_p, cbytes)
               <= budget]
    return max(fitting) if fitting else min(cands)


def _fire_kernel(*refs, TH, W, fused):
    """One (batch, row-tile) grid step.

    refs (fused):  x, wsq, bsq, w3k, bexp, out
    refs (split):  x, wsq, bsq, w3k, we1, bexp, out
      x    : (1, H+2, W, Cin)     input, zero halo row top+bottom (compute dtype)
      wsq  : (Cin, Cs_p)          squeeze 1x1 weight
      bsq  : (1, Cs_p)            squeeze bias (f32)
      w3k  : (3, 3*Cs_p, Ncols)   3x3 weight, kx folded into K ([x-1 | x | x+1] blocks)
      we1  : (Cs_p, Ce_p)         expand1x1 weight (split path only)
      bexp : (1, Cout_p)          expand bias(es) (f32)
      out  : (1, TH*W, Cout_p)    lane-dense output tile
    """
    if fused:
        x_ref, wsq_ref, bsq_ref, w3k_ref, bexp_ref, o_ref = refs
        we1_ref = None
    else:
        x_ref, wsq_ref, bsq_ref, w3k_ref, we1_ref, bexp_ref, o_ref = refs

    i = pl.program_id(1)
    n_h = pl.num_programs(1)
    Cin = x_ref.shape[-1]
    Cs_p = wsq_ref.shape[-1]
    n_cols = w3k_ref.shape[-1]
    cdt = w3k_ref.dtype

    # ---- squeeze 1x1 conv + bias + ReLU over TH + 2 rows (tile + 1-row halo) ----
    row0 = pl.multiple_of(i * TH, TH)
    xw = x_ref[0, pl.ds(row0, TH + 2), :, :].reshape((TH + 2) * W, Cin)
    s = jnp.dot(xw, wsq_ref[...], preferred_element_type=jnp.float32)
    s = jnp.maximum(s + bsq_ref[...], 0.0).reshape(TH + 2, W, Cs_p)

    # Image top/bottom halo rows must be zero for the 3x3 conv (not ReLU(bias)).
    keep_top = (i > 0).astype(jnp.float32)
    keep_bot = (i < n_h - 1).astype(jnp.float32)
    s = jnp.concatenate(
        [s[0:1] * keep_top, s[1:TH + 1], s[TH + 1:TH + 2] * keep_bot],
        axis=0).astype(cdt)

    # ---- kx folded into K: LHS lane blocks are [column x-1 | x | x+1] -----------
    zcol = jnp.zeros((TH + 2, 1, Cs_p), cdt)
    s_m1 = jnp.concatenate([zcol, s[:, :W - 1, :]], axis=1)      # column x-1
    s_p1 = jnp.concatenate([s[:, 1:, :], zcol], axis=1)          # column x+1
    s3 = jnp.concatenate([s_m1, s, s_p1], axis=-1)               # (TH+2, W, 3*Cs_p)

    # ---- expand3x3: 3 ky taps, K = 3*Cs_p each (contiguous leading-dim slices) --
    lhs0 = s3[0:TH].reshape(TH * W, 3 * Cs_p)
    acc3 = jnp.dot(lhs0, w3k_ref[0], preferred_element_type=jnp.float32)
    for ky in (1, 2):
        lhs = s3[ky:ky + TH].reshape(TH * W, 3 * Cs_p)
        acc3 = acc3 + jnp.dot(lhs, w3k_ref[ky], preferred_element_type=jnp.float32)

    if fused:
        # expand1x1 is carried by the center tap of w3k; columns are [e1 | e3 | pad].
        out = jnp.maximum(acc3 + bexp_ref[...], 0.0)
        o_ref[...] = out.reshape(1, TH * W, n_cols).astype(o_ref.dtype)
    else:
        # Split path (Ce % 128 == 0): one extra matmul for expand1x1, written into the
        # first lane-aligned half of the output tile — no wasted expand FLOPs.
        lhs_c = s[1:1 + TH].reshape(TH * W, Cs_p)
        acc1 = jnp.dot(lhs_c, we1_ref[...], preferred_element_type=jnp.float32)
        out1 = jnp.maximum(acc1 + bexp_ref[:, :n_cols], 0.0)
        out3 = jnp.maximum(acc3 + bexp_ref[:, n_cols:], 0.0)
        out = jnp.concatenate([out1, out3], axis=-1)             # lane-aligned concat
        o_ref[...] = out.reshape(1, TH * W, 2 * n_cols).astype(o_ref.dtype)


@functools.partial(jax.jit, static_argnames=("compute_dtype", "tile_rows"))
def squeeze_block_pallas(x_nchw, params, *, compute_dtype=jnp.bfloat16,
                         tile_rows=None):
    """x_nchw: (N, Cin, H, W) float32.  Returns (N, 2*Ce, H, W) float32."""
    wsq, bsq, we1, be1, w3, be3 = params
    N, Cin, H, W = x_nchw.shape
    Cs = wsq.shape[-1]
    Ce = we1.shape[-1]
    cdt = jnp.dtype(compute_dtype)

    Cs_p = _round_up(Cs, 128)
    split = (Ce % 128 == 0)               # real Fire layers: no wasted expand columns
    Ce_p = _round_up(Ce, 128)
    Cout_p = 2 * Ce_p if split else _round_up(2 * Ce, 128)
    n_cols = Ce_p if split else Cout_p    # width of the 3x3 weight / accumulator

    vmem_limit = _vmem_limit_bytes()
    if tile_rows is None:
        TH = _pick_tile_rows(H, W, Cin, Cs_p, n_cols, Cout_p, cdt.itemsize,
                             vmem_limit // 2)
    else:
        TH = int(tile_rows)
    assert H % TH == 0 and ((TH * W) % 8 == 0 or TH == H), "bad tile_rows"
    n_h = H // TH

    # ---- wrapper-side layout: NCHW -> NHWC, +1 zero halo row top/bottom ---------
    # TODO(synk): keep NHWC end-to-end in the surrounding model to avoid these
    # full-array HBM transposes around the kernel.
    x_nhwc = jnp.transpose(x_nchw, (0, 2, 3, 1))
    x_p = jnp.pad(x_nhwc, ((0, 0), (1, 1), (0, 0), (0, 0))).astype(cdt)

    # ---- weights (built once; resident in VMEM) ---------------------------------
    wsq_p = jnp.zeros((Cin, Cs_p), jnp.float32).at[:, :Cs].set(wsq).astype(cdt)
    bsq_p = jnp.zeros((1, Cs_p), jnp.float32).at[:, :Cs].set(bsq.reshape(1, Cs))

    # 3x3 weight with kx folded into K: K-rows [kx*Cs_p : kx*Cs_p+Cs] of tap ky hold
    # w3[ky, kx]; the e3 output columns start at `col0`.
    col0 = 0 if split else Ce
    w3k = jnp.zeros((3, 3 * Cs_p, n_cols), jnp.float32)
    for kx in range(3):
        w3k = w3k.at[:, kx * Cs_p:kx * Cs_p + Cs, col0:col0 + Ce].set(w3[:, kx])
    if split:
        we1_p = jnp.zeros((Cs_p, Ce_p), jnp.float32).at[:Cs, :Ce].set(we1).astype(cdt)
        bexp = jnp.zeros((1, 2 * Ce_p), jnp.float32)
        bexp = bexp.at[:, :Ce].set(be1.reshape(1, Ce))
        bexp = bexp.at[:, Ce_p:Ce_p + Ce].set(be3.reshape(1, Ce))
    else:
        w3k = w3k.at[1, Cs_p:Cs_p + Cs, :Ce].set(we1)    # center tap carries expand1x1
        bexp = jnp.zeros((1, Cout_p), jnp.float32)
        bexp = bexp.at[:, :Ce].set(be1.reshape(1, Ce))
        bexp = bexp.at[:, Ce:2 * Ce].set(be3.reshape(1, Ce))
    w3k = w3k.astype(cdt)

    def _const_spec(shape):
        # Block index never changes across the grid (weights / biases).
        # (Optionally: pipeline_mode=pl.Buffered(1) to single-buffer these blocks.)
        nd = len(shape)
        return pl.BlockSpec(shape, lambda n, i: (0,) * nd)

    in_specs = [
        # Whole halo-padded image stays resident across the row-tile axis.
        # TODO(synk): for large H*W on v7x (64 MiB VMEM) fetch only a (TH+2)-row halo
        # window per step via manual make_async_copy so x VMEM is O(TH), not O(H).
        pl.BlockSpec((1, H + 2, W, Cin), lambda n, i: (n, 0, 0, 0)),
        _const_spec((Cin, Cs_p)),
        _const_spec((1, Cs_p)),
        _const_spec((3, 3 * Cs_p, n_cols)),
    ]
    args = [x_p, wsq_p, bsq_p, w3k]
    if split:
        in_specs.append(_const_spec((Cs_p, Ce_p)))
        args.append(we1_p)
    in_specs.append(_const_spec(bexp.shape))
    args.append(bexp)

    kernel = functools.partial(_fire_kernel, TH=TH, W=W, fused=not split)

    # Advisory cost so XLA can schedule the surrounding layout ops sensibly.
    flops = 2 * N * H * W * (Cin * Cs + 10 * Cs * Ce)
    bytes_accessed = (x_p.size * x_p.dtype.itemsize + N * H * W * Cout_p * 4
                      + w3k.size * w3k.dtype.itemsize)

    out = pl.pallas_call(
        kernel,
        out_shape=jax.ShapeDtypeStruct((N, H * W, Cout_p), jnp.float32),
        grid_spec=pltpu.PrefetchScalarGridSpec(
            num_scalar_prefetch=0,
            grid=(N, n_h),
            in_specs=in_specs,
            out_specs=pl.BlockSpec((1, TH * W, Cout_p), lambda n, i: (n, i, 0)),
        ),
        compiler_params=pltpu.CompilerParams(
            # Both axes are independent.  On v7x, consider pltpu.CORE_PARALLEL on the
            # batch axis if xprof shows one TensorCore idle.
            dimension_semantics=("parallel", "parallel"),
            vmem_limit_bytes=vmem_limit),
        cost_estimate=pl.CostEstimate(flops=flops, transcendentals=0,
                                      bytes_accessed=bytes_accessed),
    )(*args)

    out = out.reshape(N, H, W, Cout_p)[..., :2 * Ce]       # drop lane padding
    return jnp.transpose(out, (0, 3, 1, 2))                # NHWC -> NCHW


def init_params(key, in_channels, channels, expand3x3_channels):
    """Deterministic synthetic parameters (Conv2d weights stored in IO / HWIO form)."""
    k1, k2, k3, k4, k5, k6 = jax.random.split(key, 6)
    wsq = 0.1 * jax.random.normal(k1, (in_channels, channels), jnp.float32)
    bsq = 0.1 * jax.random.normal(k2, (1, channels), jnp.float32)
    we1 = 0.1 * jax.random.normal(k3, (channels, expand3x3_channels), jnp.float32)
    be1 = 0.1 * jax.random.normal(k4, (1, expand3x3_channels), jnp.float32)
    w3 = 0.1 * jax.random.normal(k5, (3, 3, channels, expand3x3_channels), jnp.float32)
    be3 = 0.1 * jax.random.normal(k6, (1, expand3x3_channels), jnp.float32)
    return (wsq, bsq, we1, be1, w3, be3)


def reference_nchw(x_nchw, params):
    """Plain-JAX reference (lax.conv) for the correctness check."""
    wsq, bsq, we1, be1, w3, be3 = params
    x = jnp.transpose(x_nchw, (0, 2, 3, 1))
    dn = ("NHWC", "HWIO", "NHWC")

    def conv(x, w, b, pad):
        y = lax.conv_general_dilated(x, w, (1, 1), pad, dimension_numbers=dn)
        return jnp.maximum(y + b.reshape(1, 1, 1, -1), 0.0)

    s = conv(x, wsq.reshape(1, 1, *wsq.shape), bsq, "VALID")
    e1 = conv(s, we1.reshape(1, 1, *we1.shape), be1, "VALID")
    e3 = conv(s, w3, be3, "SAME")
    out = jnp.concatenate([e1, e3], axis=-1)
    return jnp.transpose(out, (0, 3, 1, 2))


if __name__ == "__main__":
    key = jax.random.PRNGKey(0)

    # ---- fused path (Ce < 128): N=2, Cin=4, squeeze=8, expand3x3=16, 16x16 ------
    N, Cin, H, W = 2, 4, 16, 16
    channels, expand1x1_channels, expand3x3_channels = 8, 8, 16
    kx_, kp = jax.random.split(key)
    x = jax.random.normal(kx_, (N, Cin, H, W), jnp.float32)
    params = init_params(kp, Cin, channels, expand3x3_channels)
    ref = reference_nchw(x, params)

    # f32 compute, explicit small row-tile (exercises border + interior tiles).
    out_f32 = jax.block_until_ready(
        squeeze_block_pallas(x, params, compute_dtype=jnp.float32, tile_rows=4))
    assert out_f32.shape == (N, 2 * expand3x3_channels, H, W), out_f32.shape
    assert jnp.allclose(out_f32, ref, atol=1e-4, rtol=1e-4), "f32 mismatch vs reference"

    # Default path: bf16 operands, f32 accumulation, auto row-tile.
    out_bf16 = jax.block_until_ready(squeeze_block_pallas(x, params))
    assert out_bf16.shape == (N, 2 * expand3x3_channels, H, W), out_bf16.shape
    assert jnp.allclose(out_bf16, ref, atol=5e-2, rtol=5e-2), "bf16 mismatch vs reference"

    # ---- split path (Ce % 128 == 0, real Fire sizes): expand3x3=128, 8x8 --------
    N2, Cin2, H2, W2 = 1, 4, 8, 8
    ch2, ce2 = 8, 128
    kx2, kp2 = jax.random.split(kp)
    x2 = jax.random.normal(kx2, (N2, Cin2, H2, W2), jnp.float32)
    params2 = init_params(kp2, Cin2, ch2, ce2)
    ref2 = reference_nchw(x2, params2)

    out2 = jax.block_until_ready(
        squeeze_block_pallas(x2, params2, compute_dtype=jnp.float32, tile_rows=4))
    assert out2.shape == (N2, 2 * ce2, H2, W2), out2.shape
    assert jnp.allclose(out2, ref2, atol=1e-4, rtol=1e-4), "split f32 mismatch"

    out2b = jax.block_until_ready(squeeze_block_pallas(x2, params2))   # bf16 default
    assert jnp.allclose(out2b, ref2, atol=5e-2, rtol=5e-2), "split bf16 mismatch"

    print("KERNEL_OK")
</pallas_src>

<mosaic_0001>
module attributes {stable_mosaic.version = 11 : i64} {
  func.func @_fire_kernel(%arg0: i32, %arg1: i32, %arg2: memref<1x18x16x4xf32, #tpu.memory_space<vmem>>, %arg3: memref<4x128xf32, #tpu.memory_space<vmem>>, %arg4: memref<1x128xf32, #tpu.memory_space<vmem>>, %arg5: memref<3x384x128xf32, #tpu.memory_space<vmem>>, %arg6: memref<1x128xf32, #tpu.memory_space<vmem>>, %arg7: memref<1x64x128xf32, #tpu.memory_space<vmem>>) attributes {dimension_semantics = [#tpu.dimension_semantics<parallel>, #tpu.dimension_semantics<parallel>], iteration_bounds = array<i64: 2, 4>, scalar_prefetch = 0 : i64, scratch_operands = 0 : i64, tpu.core_type = #tpu.core_type<tc>, window_params = [{transform_indices = @transform_0, window_bounds = array<i64: 1, 18, 16, 4>}, {pipeline_mode = #tpu.pipeline_mode<synchronous>, transform_indices = @transform_1, window_bounds = array<i64: 4, 128>}, {pipeline_mode = #tpu.pipeline_mode<synchronous>, transform_indices = @transform_2, window_bounds = array<i64: 1, 128>}, {pipeline_mode = #tpu.pipeline_mode<synchronous>, transform_indices = @transform_3, window_bounds = array<i64: 3, 384, 128>}, {pipeline_mode = #tpu.pipeline_mode<synchronous>, transform_indices = @transform_4, window_bounds = array<i64: 1, 128>}, {transform_indices = @transform_5, window_bounds = array<i64: 1, 64, 128>}]} {
    %c4_i32 = arith.constant 4 : i32
    %0 = arith.muli %arg1, %c4_i32 : i32
    %1 = tpu.assume_multiple %0, 4 : i32
    %c0 = arith.constant 0 : index
    %2 = arith.index_cast %1 : i32 to index
    %c0_0 = arith.constant 0 : index
    %c0_1 = arith.constant 0 : index
    %3 = vector.load %arg2[%c0, %2, %c0_0, %c0_1] : memref<1x18x16x4xf32, #tpu.memory_space<vmem>>, vector<1x6x16x4xf32>
    %4 = vector.shape_cast %3 : vector<1x6x16x4xf32> to vector<6x16x4xf32>
    %5 = vector.shape_cast %4 : vector<6x16x4xf32> to vector<96x4xf32>
    %c0_2 = arith.constant 0 : index
    %c0_3 = arith.constant 0 : index
    %6 = vector.load %arg3[%c0_2, %c0_3] : memref<4x128xf32, #tpu.memory_space<vmem>>, vector<4x128xf32>
    %cst = arith.constant dense<0.000000e+00> : vector<96x128xf32>
    %7 = tpu.matmul %5, %6, %cst {dimension_numbers = #tpu.dot_dimension_numbers<[1], [0], [0], [1], [0, 0, 1, 1], [], []>} : vector<96x4xf32>, vector<4x128xf32>, vector<96x128xf32> -> vector<96x128xf32>
    %c0_4 = arith.constant 0 : index
    %c0_5 = arith.constant 0 : index
    %8 = vector.load %arg4[%c0_4, %c0_5] : memref<1x128xf32, #tpu.memory_space<vmem>>, vector<1x128xf32>
    %9 = vector.broadcast %8 : vector<1x128xf32> to vector<96x128xf32>
    %10 = arith.addf %7, %9 : vector<96x128xf32>
    %cst_6 = arith.constant 0.000000e+00 : f32
    %11 = vector.broadcast %cst_6 : f32 to vector<96x128xf32>
    %12 = arith.maximumf %10, %11 : vector<96x128xf32>
    %13 = vector.shape_cast %12 : vector<96x128xf32> to vector<6x16x128xf32>
    %c0_i32 = arith.constant 0 : i32
    %14 = arith.cmpi sgt, %arg1, %c0_i32 : i32
    %15 = arith.extui %14 : i1 to i32
    %16 = arith.sitofp %15 : i32 to f32
    %c3_i32 = arith.constant 3 : i32
    %17 = arith.cmpi slt, %arg1, %c3_i32 : i32
    %18 = arith.extui %17 : i1 to i32
    %19 = arith.sitofp %18 : i32 to f32
    %20 = vector.extract_strided_slice %13 {offsets = [0, 0, 0], sizes = [1, 16, 128], strides = [1, 1, 1]} : vector<6x16x128xf32> to vector<1x16x128xf32>
    %21 = vector.broadcast %16 : f32 to vector<1x16x128xf32>
    %22 = arith.mulf %20, %21 : vector<1x16x128xf32>
    %23 = vector.extract_strided_slice %13 {offsets = [1, 0, 0], sizes = [4, 16, 128], strides = [1, 1, 1]} : vector<6x16x128xf32> to vector<4x16x128xf32>
    %24 = vector.extract_strided_slice %13 {offsets = [5, 0, 0], sizes = [1, 16, 128], strides = [1, 1, 1]} : vector<6x16x128xf32> to vector<1x16x128xf32>
    %25 = vector.broadcast %19 : f32 to vector<1x16x128xf32>
    %26 = arith.mulf %24, %25 : vector<1x16x128xf32>
    %27 = tpu.concatenate %22, %23, %26 in 0 : vector<1x16x128xf32>, vector<4x16x128xf32>, vector<1x16x128xf32> -> vector<6x16x128xf32>
    %cst_7 = arith.constant 0.000000e+00 : f32
    %28 = vector.broadcast %cst_7 : f32 to vector<6x1x128xf32>
    %29 = vector.extract_strided_slice %27 {offsets = [0, 0, 0], sizes = [6, 15, 128], strides = [1, 1, 1]} : vector<6x16x128xf32> to vector<6x15x128xf32>
    %30 = tpu.concatenate %28, %29 in 1 : vector<6x1x128xf32>, vector<6x15x128xf32> -> vector<6x16x128xf32>
    %31 = vector.extract_strided_slice %27 {offsets = [0, 1, 0], sizes = [6, 15, 128], strides = [1, 1, 1]} : vector<6x16x128xf32> to vector<6x15x128xf32>
    %32 = tpu.concatenate %31, %28 in 1 : vector<6x15x128xf32>, vector<6x1x128xf32> -> vector<6x16x128xf32>
    %33 = tpu.concatenate %30, %27, %32 in 2 : vector<6x16x128xf32>, vector<6x16x128xf32>, vector<6x16x128xf32> -> vector<6x16x384xf32>
    %34 = vector.extract_strided_slice %33 {offsets = [0, 0, 0], sizes = [4, 16, 384], strides = [1, 1, 1]} : vector<6x16x384xf32> to vector<4x16x384xf32>
    %35 = vector.shape_cast %34 : vector<4x16x384xf32> to vector<64x384xf32>
    %c0_8 = arith.constant 0 : index
    %c0_9 = arith.constant 0 : index
    %c0_10 = arith.constant 0 : index
    %36 = vector.load %arg5[%c0_8, %c0_9, %c0_10] : memref<3x384x128xf32, #tpu.memory_space<vmem>>, vector<1x384x128xf32>
    %37 = vector.shape_cast %36 : vector<1x384x128xf32> to vector<384x128xf32>
    %cst_11 = arith.constant dense<0.000000e+00> : vector<64x128xf32>
    %38 = tpu.matmul %35, %37, %cst_11 {dimension_numbers = #tpu.dot_dimension_numbers<[1], [0], [0], [1], [0, 0, 1, 1], [], []>} : vector<64x384xf32>, vector<384x128xf32>, vector<64x128xf32> -> vector<64x128xf32>
    %39 = vector.extract_strided_slice %33 {offsets = [1, 0, 0], sizes = [4, 16, 384], strides = [1, 1, 1]} : vector<6x16x384xf32> to vector<4x16x384xf32>
    %40 = vector.shape_cast %39 : vector<4x16x384xf32> to vector<64x384xf32>
    %c1 = arith.constant 1 : index
    %c0_12 = arith.constant 0 : index
    %c0_13 = arith.constant 0 : index
    %41 = vector.load %arg5[%c1, %c0_12, %c0_13] : memref<3x384x128xf32, #tpu.memory_space<vmem>>, vector<1x384x128xf32>
    %42 = vector.shape_cast %41 : vector<1x384x128xf32> to vector<384x128xf32>
    %cst_14 = arith.constant dense<0.000000e+00> : vector<64x128xf32>
    %43 = tpu.matmul %40, %42, %cst_14 {dimension_numbers = #tpu.dot_dimension_numbers<[1], [0], [0], [1], [0, 0, 1, 1], [], []>} : vector<64x384xf32>, vector<384x128xf32>, vector<64x128xf32> -> vector<64x128xf32>
    %44 = arith.addf %38, %43 : vector<64x128xf32>
    %45 = vector.extract_strided_slice %33 {offsets = [2, 0, 0], sizes = [4, 16, 384], strides = [1, 1, 1]} : vector<6x16x384xf32> to vector<4x16x384xf32>
    %46 = vector.shape_cast %45 : vector<4x16x384xf32> to vector<64x384xf32>
    %c2 = arith.constant 2 : index
    %c0_15 = arith.constant 0 : index
    %c0_16 = arith.constant 0 : index
    %47 = vector.load %arg5[%c2, %c0_15, %c0_16] : memref<3x384x128xf32, #tpu.memory_space<vmem>>, vector<1x384x128xf32>
    %48 = vector.shape_cast %47 : vector<1x384x128xf32> to vector<384x128xf32>
    %cst_17 = arith.constant dense<0.000000e+00> : vector<64x128xf32>
    %49 = tpu.matmul %46, %48, %cst_17 {dimension_numbers = #tpu.dot_dimension_numbers<[1], [0], [0], [1], [0, 0, 1, 1], [], []>} : vector<64x384xf32>, vector<384x128xf32>, vector<64x128xf32> -> vector<64x128xf32>
    %50 = arith.addf %44, %49 : vector<64x128xf32>
    %c0_18 = arith.constant 0 : index
    %c0_19 = arith.constant 0 : index
    %51 = vector.load %arg6[%c0_18, %c0_19] : memref<1x128xf32, #tpu.memory_space<vmem>>, vector<1x128xf32>
    %52 = vector.broadcast %51 : vector<1x128xf32> to vector<64x128xf32>
    %53 = arith.addf %50, %52 : vector<64x128xf32>
    %cst_20 = arith.constant 0.000000e+00 : f32
    %54 = vector.broadcast %cst_20 : f32 to vector<64x128xf32>
    %55 = arith.maximumf %53, %54 : vector<64x128xf32>
    %56 = vector.shape_cast %55 : vector<64x128xf32> to vector<1x64x128xf32>
    %c0_21 = arith.constant 0 : index
    %c0_22 = arith.constant 0 : index
    %c0_23 = arith.constant 0 : index
    %57 = vector.load %arg7[%c0_21, %c0_22, %c0_23] : memref<1x64x128xf32, #tpu.memory_space<vmem>>, vector<1x64x128xf32>
    tpu.vector_store %arg7[%c0_21, %c0_22, %c0_23], %56 {strides = array<i32>} : memref<1x64x128xf32, #tpu.memory_space<vmem>>, vector<1x64x128xf32>,
    return
  }
  func.func @transform_0(%arg0: i32, %arg1: i32) -> (i32, i32, i32, i32) {
    %c0_i32 = arith.constant 0 : i32
    %c0_i32_0 = arith.constant 0 : i32
    %c0_i32_1 = arith.constant 0 : i32
    %c0_i32_2 = arith.constant 0 : i32
    return %arg0, %c0_i32, %c0_i32_0, %c0_i32_1 : i32, i32, i32, i32
  }
  func.func @transform_1(%arg0: i32, %arg1: i32) -> (i32, i32) {
    %c0_i32 = arith.constant 0 : i32
    %c0_i32_0 = arith.constant 0 : i32
    %c0_i32_1 = arith.constant 0 : i32
    return %c0_i32, %c0_i32_0 : i32, i32
  }
  func.func @transform_2(%arg0: i32, %arg1: i32) -> (i32, i32) {
    %c0_i32 = arith.constant 0 : i32
    %c0_i32_0 = arith.constant 0 : i32
    %c0_i32_1 = arith.constant 0 : i32
    return %c0_i32, %c0_i32_0 : i32, i32
  }
  func.func @transform_3(%arg0: i32, %arg1: i32) -> (i32, i32, i32) {
    %c0_i32 = arith.constant 0 : i32
    %c0_i32_0 = arith.constant 0 : i32
    %c0_i32_1 = arith.constant 0 : i32
    %c0_i32_2 = arith.constant 0 : i32
    return %c0_i32, %c0_i32_0, %c0_i32_1 : i32, i32, i32
  }
  func.func @transform_4(%arg0: i32, %arg1: i32) -> (i32, i32) {
    %c0_i32 = arith.constant 0 : i32
    %c0_i32_0 = arith.constant 0 : i32
    %c0_i32_1 = arith.constant 0 : i32
    return %c0_i32, %c0_i32_0 : i32, i32
  }
  func.func @transform_5(%arg0: i32, %arg1: i32) -> (i32, i32, i32) {
    %c0_i32 = arith.constant 0 : i32
    %c0_i32_0 = arith.constant 0 : i32
    return %arg0, %arg1, %c0_i32 : i32, i32, i32
  }
}

</mosaic_0001>

<bundles_post_ra>
// kernel: squeeze_block_pallas.1
= control target key start
LH: loop header
LB: loop body
LE: loop exit
PB: predicated region body
PF: predicated region fallthrough
CT: control target
= control target key end

     0   :  { %s2125_s18 = smov 0   ;;  %s2127_s19 = smov 0   ;;  %s2975_s0 = inlined_call_operand.vmem [shape: f32[2,18,16,4], index: 0, kind: input, shape index: {}]   ;;  %s2976_s1 = inlined_call_operand.vmem [shape: f32[4,128], index: 1, kind: input, shape index: {}]   ;;  %s2977_s2 = inlined_call_operand.vmem [shape: f32[1,128], index: 2, kind: input, shape index: {}]   ;;  %s2978_s3 = inlined_call_operand.vmem [shape: f32[3,384,128], index: 3, kind: input, shape index: {}]   ;;  %s2979_s4 = inlined_call_operand.vmem [shape: f32[1,128], index: 4, kind: input, shape index: {}]   ;;  %s2980_s5 = inlined_call_operand.vmem [shape: f32[2,256,128], index: 5, kind: output, shape index: {}]  }
   0x1   :  { %s2129_s20 = smov 0   ;;  %s2131_s21 = smov 0  }
   0x2   :  { %s2133_s22 = smov 0  }
   0x3 LB: > { %s24_s23 = sadd.s32 1, %s2085_s20  ;;  %s27_s24 = sadd.s32 1, %s2089_s21  ;;  %s2093_s22 = sphi %s2133_s22, %s15_s22   ;;  %s2089_s21 = sphi %s2131_s21, %s2986_s21   ;;  %s2085_s20 = sphi %s2129_s20, %s2985_s20   ;;  %s2081_s19 = sphi %s2127_s19, %s2984_s19   ;;  %s2077_s18 = sphi %s2125_s18, %s2983_s18  }
   0x4   : > { %p25_p0 = scmp.ge.s32.totalorder %s24_s23, 4  ;;  %p1452_p1 = scmp.ge.s32.totalorder %s2093_s22, 1 }
   0x5   : > { %p201_p2 = scmp.lt.s32.totalorder %s2093_s22, 9 }
   0x6   : > { %s2988_s23 = smov (%p25_p0, %s24_s23), 0  ;;  %s2990_s24 = smov (!%p25_p0, %s27_s24), %s2089_s21 }
   0x7   : > { %p202_p3 = pnand %p1452_p1, %p201_p2  ;;  %p29_p4 = scmp.ge.s32.totalorder %s2990_s24, 2 }
   0x8   : > { %p233_p5 = scmp.lt.s32.totalorder (!%p202_p3), %s2081_s19, 1  ;;  %s1608_s15 = sshll.u32 (!%p202_p3), %s2077_s18, 6 }
   0x9   : > { %s2992_s24 = smov (%p29_p4, %s2990_s24), 0  ;;  %205 = sbr.rel (%p202_p3) target bundleno = 548 (0x224), region = 40 }
   0xa   : > { %p449_p6 = scmp.gt.s32.totalorder (!%p202_p3), %s2077_s18, 0  ;;  %p452_p7 = scmp.lt.s32.totalorder (!%p202_p3), %s2077_s18, 3 }
   0xe   : > { %v263_v0 = vld [vmem:[%s2976_s1] sm:$0xf]  ;;  %vm308_vm0 = vcmask 1043456   ;;  %v1504_v1 = vld [vmem:[%s2978_s3 + $0x278] sm:$0xff]  ;;  %v1503_v3 = vld [vmem:[%s2978_s3 + $0x270] sm:$0xff]  ;;  %s2994_s19 = smov (!%p233_p5, %s2081_s19), 1 }
   0xf   : > { %1862 = vmatprep.subr.msk.mxu0 %vm308_vm0, %v263_v0  ;;  %v1488_v2 = vld [vmem:[%s2978_s3 + $0x1f8] sm:$0xff]  ;;  %1622 = vmatprep.subr.mxu1 %v1504_v1  ;;  %v1487_v5 = vld [vmem:[%s2978_s3 + $0x1f0] sm:$0xff]  ;;  %v1502_v6 = vld [vmem:[%s2978_s3 + $0x268] sm:$0xff]  ;;  %s2014_s14 = smul.u32 288, %s2994_s19  ;;  %vm271_vm1 = vcmask 31744   ;;  %vm473_vm2 = vcmask 1040384  }
  0x10   : > { %1863 = vmatpush3.msk.msra.mxu0 %vm308_vm0, %v263_v0  ;;  %v1520_v4 = vld [vmem:[%s2978_s3 + $0x2f8] sm:$0xff]  ;;  %1623 = vmatpush3.msra.mxu1 %v1488_v2  ;;  %v1486_v7 = vld [vmem:[%s2978_s3 + $0x1e8] sm:$0xff]  ;;  %v1501_v8 = vld [vmem:[%s2978_s3 + $0x260] sm:$0xff]  ;;  %vm510_vm4 = vcmask 1046528   ;;  %s2427_s16 = scalar_select %p449_p6, 1, 0 }
  0x11   : > { %1882 = vmatprep.subr.mxu0 %v1520_v4  ;;  %1624 = vmatprep.subr.mxu1 %v1503_v3  ;;  %s237_s29 = scalar_lea.vmem %s2975_s0, %s2014_s14  ;;  %v1485_v9 = vld [vmem:[%s2978_s3 + $0x1e0] sm:$0xff]  ;;  %v1500_v10 = vld [vmem:[%s2978_s3 + $0x258] sm:$0xff]  ;;  %v1519_v14 = vld [vmem:[%s2978_s3 + $0x2f0] sm:$0xff]  ;;  %s1455_s17 = sshll.u32 %s2994_s19, 5 }
  0x12   : > { %1625 = vmatpush3.msra.mxu1 %v1487_v5  ;;  %s2194_s7 = scalar_lea.vmem %s237_s29, %s1608_s15  ;;  %v1484_v15 = vld [vmem:[%s2978_s3 + $0x1d8] sm:$0xff]  ;;  %v1499_v16 = vld [vmem:[%s2978_s3 + $0x250] sm:$0xff]  ;;  %v1518_v18 = vld [vmem:[%s2978_s3 + $0x2e8] sm:$0xff]  ;;  %s451_s9 = scvt.s32.f32 %s2427_s16 }
  0x13   : > { %1626 = vmatprep.subr.mxu1 %v1502_v6  ;;  %v251_v11 = vld [vmem:[%s2194_s7] sm:$0xff]  ;;  %v252_v12 = vld [vmem:[%s2194_s7 + $0x8] sm:$0xff]  ;;  %v253_v13 = vld [vmem:[%s2194_s7 + $0x10] sm:$0xff]  ;;  %s2783_s12 = scalar_select %p452_p7, 1, 0 }
  0x14   : > { %1627 = vmatpush3.msra.mxu1 %v1486_v7  ;;  %1864 = vmatprep.mubr.msk.f32.mxu0 %vm271_vm1, %v251_v11  ;;  %v254_v17 = vld [vmem:[%s2194_s7 + $0x18] sm:$0xff]  ;;  %v255_v19 = vld [vmem:[%s2194_s7 + $0x20] sm:$0xff]  ;;  %v1483_v21 = vld [vmem:[%s2978_s3 + $0x1d0] sm:$0xff]  ;;  %s1454_s16 = sshll.u32 %s2077_s18, 3 }
  0x15   : > { %1628 = vmatprep.subr.mxu1 %v1501_v8  ;;  %1865 = vmatmul.mubr.msk.f32.vlgmr.msra.gmra.mxu0 %vm271_vm1, %v252_v12  ;;  %v1517_v20 = vld [vmem:[%s2978_s3 + $0x2e0] sm:$0xff]  ;;  %v1498_v22 = vld [vmem:[%s2978_s3 + $0x248] sm:$0xff]  ;;  %v1516_v24 = vld [vmem:[%s2978_s3 + $0x2d8] sm:$0xff]  ;;  %s454_s29 = scvt.s32.f32 %s2783_s12  ;;  %p241_p8 = scmp.lt.s32.totalorder %s1454_s16, 31 }
  0x16   : > { %1629 = vmatpush3.msra.mxu1 %v1485_v9  ;;  %1867 = vmatprep.mubr.msk.f32.mxu0 %vm271_vm1, %v253_v13  ;;  %v256_v23 = vld [vmem:[%s2194_s7 + $0x28] sm:$0xff]  ;;  %v257_v25 = vld [vmem:[%s2194_s7 + $0x30] sm:$0xff]  ;;  %v1497_v28 = vld [vmem:[%s2978_s3 + $0x240] sm:$0xff] }
  0x17   : > { %1630 = vmatprep.subr.mxu1 %v1500_v10  ;;  %1883 = vmatpush3.msra.mxu0 %v1520_v4  ;;  %v1515_v26 = vld [vmem:[%s2978_s3 + $0x2d0] sm:$0xff]  ;;  %v1482_v27 = vld [vmem:[%s2978_s3 + $0x1c8] sm:$0xff]  ;;  %v258_v29 = vld [vmem:[%s2194_s7 + $0x38] sm:$0xff]  ;;  %s2996_s16 = smov (!%p241_p8, %s1454_s16), 31 }
  0x18   : > { %1884 = vmatprep.subr.mxu0 %v1519_v14  ;;  %1631 = vmatpush3.msra.mxu1 %v1484_v15  ;;  %v1514_v30 = vld [vmem:[%s2978_s3 + $0x2c8] sm:$0xff]  ;;  %v259_v31 = vld [vmem:[%s2194_s7 + $0x40] sm:$0xff]  ;;  %v1496_v33 = vld [vmem:[%s2978_s3 + $0x238] sm:$0xff]  ;;  %s244_s18 = sadd.s32 %s1455_s17, %s2996_s16 }
  0x19   : > { %1885 = vmatpush3.msra.mxu0 %v1519_v14  ;;  %1632 = vmatprep.subr.mxu1 %v1499_v16  ;;  %v1481_v32 = vld [vmem:[%s2978_s3 + $0x1c0] sm:$0xff]  ;;  %v1480_v35 = vld [vmem:[%s2978_s3 + $0x1b8] sm:$0xff]  ;;  %v260_v36 = vld [vmem:[%s2194_s7 + $0x48] sm:$0xff]  ;;  %s1456_s19 = sshll.u32 %s244_s18, 3 }
  0x1a   : > { %1868 = vmatmul.mubr.msk.f32.gmra.mxu0 %vm271_vm1, %v254_v17  ;;  %1886 = vmatprep.subr.mxu0 %v1518_v18  ;;  %v1513_v34 = vld [vmem:[%s2978_s3 + $0x2c0] sm:$0xff]  ;;  %v1495_v37 = vld [vmem:[%s2978_s3 + $0x230] sm:$0xff]  ;;  %v1512_v39 = vld [vmem:[%s2978_s3 + $0x2b8] sm:$0xff]  ;;  %s2920_s28 = scalar_lea.vmem %s2980_s5, %s1456_s19 }
  0x1b   : > { %1870 = vmatprep.mubr.msk.f32.mxu0 %vm271_vm1, %v255_v19  ;;  %1887 = vmatpush3.msra.mxu0 %v1518_v18  ;;  %v261_v38 = vld [vmem:[%s2194_s7 + $0x50] sm:$0xff]  ;;  %v262_v41 = vld [vmem:[%s2194_s7 + $0x58] sm:$0xff]  ;;  %v1494_v43 = vld [vmem:[%s2978_s3 + $0x228] sm:$0xff] }
  0x1c   : > { %1888 = vmatprep.subr.mxu0 %v1517_v20  ;;  %1633 = vmatpush3.msra.mxu1 %v1483_v21  ;;  %v1479_v40 = vld [vmem:[%s2978_s3 + $0x1b0] sm:$0xff]  ;;  %v1478_v44 = vld [vmem:[%s2978_s3 + $0x1a8] sm:$0xff]  ;;  %v1493_v46 = vld [vmem:[%s2978_s3 + $0x220] sm:$0xff] }
  0x1d   : > { %1889 = vmatpush3.msra.mxu0 %v1517_v20  ;;  %1634 = vmatprep.subr.mxu1 %v1498_v22  ;;  %v1511_v42 = vld [vmem:[%s2978_s3 + $0x2b0] sm:$0xff]  ;;  %v1510_v45 = vld [vmem:[%s2978_s3 + $0x2a8] sm:$0xff]  ;;  %v1477_v47 = vld [vmem:[%s2978_s3 + $0x1a0] sm:$0xff] }
  0x1e   : > { %1871 = vmatmul.mubr.msk.f32.gmra.mxu0 %vm271_vm1, %v256_v23  ;;  %1890 = vmatprep.subr.mxu0 %v1516_v24  ;;  %v1509_v48 = vld [vmem:[%s2978_s3 + $0x2a0] sm:$0xff]  ;;  %v1492_v49 = vld [vmem:[%s2978_s3 + $0x218] sm:$0xff]  ;;  %v1491_v52 = vld [vmem:[%s2978_s3 + $0x210] sm:$0xff] }
  0x1f   : > { %1873 = vmatprep.mubr.msk.f32.mxu0 %vm271_vm1, %v257_v25  ;;  %1891 = vmatpush3.msra.mxu0 %v1516_v24  ;;  %v1476_v50 = vld [vmem:[%s2978_s3 + $0x198] sm:$0xff]  ;;  %v1475_v53 = vld [vmem:[%s2978_s3 + $0x190] sm:$0xff]  ;;  %v1490_v55 = vld [vmem:[%s2978_s3 + $0x208] sm:$0xff] }
  0x20   : > { %1892 = vmatprep.subr.mxu0 %v1515_v26  ;;  %1635 = vmatpush3.msra.mxu1 %v1482_v27  ;;  %v1508_v51 = vld [vmem:[%s2978_s3 + $0x298] sm:$0xff]  ;;  %v1507_v54 = vld [vmem:[%s2978_s3 + $0x290] sm:$0xff]  ;;  %v1474_v56 = vld [vmem:[%s2978_s3 + $0x188] sm:$0xff] }
  0x21   : > { %1893 = vmatpush3.msra.mxu0 %v1515_v26  ;;  %1636 = vmatprep.subr.mxu1 %v1497_v28  ;;  %v1506_v57 = vld [vmem:[%s2978_s3 + $0x288] sm:$0xff]  ;;  %v1489_v58 = vld [vmem:[%s2978_s3 + $0x200] sm:$0xff]  ;;  %v578_v61 = vld [vmem:[%s2978_s3 + $0xf8] sm:$0xff] }
  0x22   : > { %1874 = vmatmul.mubr.msk.f32.gmra.mxu0 %vm271_vm1, %v258_v29  ;;  %1894 = vmatprep.subr.mxu0 %v1514_v30  ;;  %v1473_v59 = vld [vmem:[%s2978_s3 + $0x180] sm:$0xff]  ;;  %v594_v62 = vld [vmem:[%s2978_s3 + $0x178] sm:$0xff]  ;;  %vm2358_vm3 = vmneg %vm473_vm2 }
  0x23   : > { %1876 = vmatprep.mubr.msk.f32.mxu0 %vm271_vm1, %v259_v31  ;;  %1637 = vmatpush3.msra.mxu1 %v1481_v32  ;;  %v1505_v60 = vld [vmem:[%s2978_s3 + $0x280] sm:$0xff]  ;;  %v562_v16 = vld [vmem:[%s2978_s3 + $0x78] sm:$0xff]  ;;  %v577_v19 = vld [vmem:[%s2978_s3 + $0xf0] sm:$0xff] }
  0x24   : > { %1895 = vmatpush3.msra.mxu0 %v1514_v30  ;;  %1638 = vmatprep.subr.mxu1 %v1496_v33  ;;  %v2348_v1 = vld [vmem:[%s2977_s2] ss:$0 sm:$0xff]  ;;  %v561_v23 = vld [vmem:[%s2978_s3 + $0x70] sm:$0xff]  ;;  %v576_v25 = vld [vmem:[%s2978_s3 + $0xe8] sm:$0xff] }
  0x25   : > { %1896 = vmatprep.subr.mxu0 %v1513_v34  ;;  %1639 = vmatpush3.msra.mxu1 %v1480_v35  ;;  %v593_v29 = vld [vmem:[%s2978_s3 + $0x170] sm:$0xff]  ;;  %v560_v33 = vld [vmem:[%s2978_s3 + $0x68] sm:$0xff] }
  0x26   : > { %1877 = vmatmul.mubr.msk.f32.gmra.mxu0 %vm271_vm1, %v260_v36  ;;  %1640 = vmatprep.subr.mxu1 %v1495_v37 }
  0x27   : > { %1879 = vmatprep.mubr.msk.f32.mxu0 %vm271_vm1, %v261_v38  ;;  %1897 = vmatpush3.msra.mxu0 %v1513_v34 }
  0x28   : > { %1898 = vmatprep.subr.mxu0 %v1512_v39  ;;  %1641 = vmatpush3.msra.mxu1 %v1479_v40  ;;  %v592_v40 = vld [vmem:[%s2978_s3 + $0x168] sm:$0xff] }
  0x29   : > { %1899 = vmatpush3.msra.mxu0 %v1512_v39  ;;  %1642 = vmatprep.subr.mxu1 %v1494_v43  ;;  %v575_v39 = vld [vmem:[%s2978_s3 + $0xe0] sm:$0xff] }
  0x2a   : > { %1880 = vmatmul.mubr.msk.f32.gmra.mxu0 %vm271_vm1, %v262_v41  ;;  %1900 = vmatprep.subr.mxu0 %v1511_v42  ;;  %v559_v43 = vld [vmem:[%s2978_s3 + $0x60] sm:$0xff] }
  0x2b   : > { %1901 = vmatpush3.msra.mxu0 %v1511_v42  ;;  %1643 = vmatpush3.msra.mxu1 %v1478_v44 }
  0x2c   : > { %1902 = vmatprep.subr.mxu0 %v1510_v45  ;;  %1644 = vmatprep.subr.mxu1 %v1493_v46  ;;  %v574_v46 = vld [vmem:[%s2978_s3 + $0xd8] sm:$0xff] }
  0x2d   : > { %1903 = vmatpush3.msra.mxu0 %v1510_v45  ;;  %1645 = vmatpush3.msra.mxu1 %v1477_v47 }
  0x2e   : > { %1904 = vmatprep.subr.mxu0 %v1509_v48  ;;  %1646 = vmatprep.subr.mxu1 %v1492_v49 }
  0x2f   : > { %1905 = vmatpush3.msra.mxu0 %v1509_v48  ;;  %1647 = vmatpush3.msra.mxu1 %v1476_v50  ;;  %v591_v50 = vld [vmem:[%s2978_s3 + $0x160] sm:$0xff] }
  0x30   : > { %1906 = vmatprep.subr.mxu0 %v1508_v51  ;;  %1648 = vmatprep.subr.mxu1 %v1491_v52  ;;  %v558_v52 = vld [vmem:[%s2978_s3 + $0x58] sm:$0xff] }
  0x31   : > { %1907 = vmatpush3.msra.mxu0 %v1508_v51  ;;  %1649 = vmatpush3.msra.mxu1 %v1475_v53 }
  0x32   : > { %1908 = vmatprep.subr.mxu0 %v1507_v54  ;;  %1650 = vmatprep.subr.mxu1 %v1490_v55  ;;  %v573_v55 = vld [vmem:[%s2978_s3 + $0xd0] sm:$0xff] }
  0x33   : > { %1909 = vmatpush3.msra.mxu0 %v1507_v54  ;;  %1651 = vmatpush3.msra.mxu1 %v1474_v56  ;;  %v590_v56 = vld [vmem:[%s2978_s3 + $0x158] sm:$0xff] }
  0x34   : > { %1910 = vmatprep.subr.mxu0 %v1506_v57  ;;  %1652 = vmatprep.subr.mxu1 %v1489_v58  ;;  %v557_v58 = vld [vmem:[%s2978_s3 + $0x50] sm:$0xff] }
  0x35   : > { %1911 = vmatpush3.msra.mxu0 %v1506_v57  ;;  %1653 = vmatpush3.msra.mxu1 %v1473_v59 }
  0x36   : > { %1912 = vmatprep.subr.mxu0 %v1505_v60  ;;  %1702 = vmatprep.subr.mxu1 %v578_v61 }
  0x37   : > { %1913 = vmatpush3.msra.mxu0 %v1505_v60 }
  0x38   : > { %1926 = vmatprep.subr.mxu0 %v594_v62 }
  0xd5   : > { %v2343_v63 = vpop.f32.mrf.mxu0 }
  0xd6   : > { %v384_v47 = vadd.f32 %v2343_v63, %v2348_v1  ;;  %v572_v63 = vld [vmem:[%s2978_s3 + $0xc8] sm:$0xff] }
  0xd7   : > { %v378_v0 = vpop.f32.mrf.mxu0 }
  0xd8   : > { %v379_v41 = vadd.f32 %v2348_v1, %v378_v0  ;;  %v438_v57 = vmax.f32 %v384_v47, 0.0  ;;  %v582_v47 = vld [vmem:[%s2978_s3 + $0x118] sm:$0xff] }
  0xda   : > { %v1869_v2 = vpop.f32.mrf.mxu0  ;;  %v437_v53 = vmax.f32 %v379_v41, 0.0  ;;  %v566_v41 = vld [vmem:[%s2978_s3 + $0x98] sm:$0xff] }
  0xdb   : > { %v394_v3 = vadd.f32 %v1869_v2, %v2348_v1  ;;  %v589_v2 = vld [vmem:[%s2978_s3 + $0x150] sm:$0xff] }
  0xdc   : > { %v388_v4 = vpop.f32.mrf.mxu0 }
  0xdd   : > { %v2351_v5 = vmax.f32 %v394_v3, 0.0  ;;  %v389_v6 = vadd.f32 %v2348_v1, %v388_v4  ;;  %v556_v3 = vld [vmem:[%s2978_s3 + $0x48] sm:$0xff] }
  0xde   : > { %v1872_v7 = vpop.f32.mrf.mxu0 }
  0xdf   : > { %v2354_v8 = vmax.f32 %v389_v6, 0.0  ;;  %v404_v9 = vadd.f32 %v1872_v7, %v2348_v1  ;;  %v2363_v12 = vrot.slane %v2351_v5, 1  ;;  %v478_v30 = vrot.slane %v2351_v5, 7 }
  0xe0   : > { %v398_v10 = vpop.f32.mrf.mxu0 }
  0xe1   : > { %v2365_v13 = vmax.f32 %v404_v9, 0.0  ;;  %v399_v14 = vadd.f32 %v2348_v1, %v398_v10  ;;  %708 = vmatprep.mubr.f32.mxu1 %v2354_v8  ;;  %v2370_v15 = vrot.slane %v2354_v8, 7  ;;  %v514_v17 = vrot.slane %v2354_v8, 1  ;;  %v571_v9 = vld [vmem:[%s2978_s3 + $0xc0] sm:$0xff]  ;;  %v588_v10 = vld [vmem:[%s2978_s3 + $0x148] sm:$0xff] }
  0xe2   : > { %v1875_v18 = vpop.f32.mrf.mxu0 }
  0xe3   : > { %v2379_v20 = vmax.f32 %v399_v14, 0.0  ;;  %v414_v21 = vadd.f32 %v1875_v18, %v2348_v1  ;;  %1522 = vmatmul.mubr.msk.f32.vlgmr.msra.gmra.mxu1 %vm2358_vm3, %v2370_v15  ;;  %v2387_v22 = vsel %vm510_vm4, %v514_v17, %v2363_v12  ;;  %v2398_v26 = vrot.slane %v2365_v13, 1  ;;  %v555_v14 = vld [vmem:[%s2978_s3 + $0x40] sm:$0xff]  ;;  %v570_v17 = vld [vmem:[%s2978_s3 + $0xb8] sm:$0xff] }
  0xe4   : > { %1703 = vmatpush3.msra.mxu1 %v562_v16  ;;  %v408_v24 = vpop.f32.mrf.mxu0  ;;  %713 = vmatprep.mubr.f32.mxu1 %v2351_v5  ;;  %v2419_v36 = vsel %vm473_vm2, %v2370_v15, %v478_v30  ;;  %v481_v59 = vrot.slane %v2365_v13, 7  ;;  %v587_v18 = vld [vmem:[%s2978_s3 + $0x140] sm:$0xff] }
  0xe5   : > { %v2400_v27 = vmax.f32 %v414_v21, 0.0  ;;  %v409_v28 = vadd.f32 %v2348_v1, %v408_v24  ;;  %1914 = vmatprep.mubr.f32.mxu0 %v2387_v22  ;;  %1704 = vmatprep.subr.mxu1 %v577_v19  ;;  %v517_v31 = vrot.slane %v2379_v20, 1  ;;  %v2463_v51 = vrot.slane %v2379_v20, 7  ;;  %v554_v24 = vld [vmem:[%s2978_s3 + $0x38] sm:$0xff] }
  0xe6   : > { %1915 = vmatmul.mubr.msk.f32.vlgmr.msra.gmra.mxu0 %vm510_vm4, %v2363_v12  ;;  %1705 = vmatpush3.msra.mxu1 %v561_v23  ;;  %v1878_v32 = vpop.f32.mrf.mxu0 }
  0xe7   : > { %v2414_v34 = vmax.f32 %v409_v28, 0.0  ;;  %1927 = vmatpush3.msra.mxu0 %v594_v62  ;;  %v424_v35 = vadd.f32 %v1878_v32, %v2348_v1  ;;  %1706 = vmatprep.subr.mxu1 %v576_v25  ;;  %v2423_v37 = vsel %vm510_vm4, %v517_v31, %v2398_v26  ;;  %v2443_v45 = vrot.slane %v2400_v27, 1  ;;  %v569_v25 = vld [vmem:[%s2978_s3 + $0xb0] sm:$0xff]  ;;  %v586_v28 = vld [vmem:[%s2978_s3 + $0x138] sm:$0xff]  ;;  %v568_v31 = vld [vmem:[%s2978_s3 + $0xa8] sm:$0xff] }
  0xe8   : > { %1928 = vmatprep.subr.mxu0 %v593_v29  ;;  %714 = vmatmul.mubr.f32.gmra.mxu1 %v2419_v36  ;;  %v418_v38 = vpop.f32.mrf.mxu0  ;;  %v455_v62 = vstv %s451_s9  ;;  %v2508_v6 = vsel %vm473_vm2, %v2463_v51, %v481_v59  ;;  %v484_v30 = vrot.slane %v2400_v27, 7  ;;  %v585_v32 = vld [vmem:[%s2978_s3 + $0x130] sm:$0xff]  ;;  %v580_v59 = vld [vmem:[%s2978_s3 + $0x108] sm:$0xff] }
  0xe9   : > { %1707 = vmatpush3.msra.mxu1 %v560_v33  ;;  %1929 = vmatpush3.msra.mxu0 %v593_v29  ;;  %v419_v42 = vadd.f32 %v2348_v1, %v418_v38  ;;  %v520_v44 = vrot.slane %v2414_v34, 1  ;;  %v2452_v48 = vmax.f32 %v424_v35, 0.0  ;;  %v2494_v0 = vmul.f32 %v455_v62, %v437_v53  ;;  %v553_v29 = vld [vmem:[%s2978_s3 + $0x30] sm:$0xff]  ;;  %v552_v33 = vld [vmem:[%s2978_s3 + $0x28] sm:$0xff]  ;;  %v567_v38 = vld [vmem:[%s2978_s3 + $0xa0] sm:$0xff] }
  0xea   : > { %718 = vmatprep.mubr.f32.mxu1 %v2379_v20  ;;  %1917 = vmatprep.mubr.f32.mxu0 %v2423_v37  ;;  %v2504_v4 = vmul.f32 %v455_v62, %v438_v57  ;;  %v2540_v23 = vrot.slane %v2414_v34, 7  ;;  %v564_v53 = vld [vmem:[%s2978_s3 + $0x88] sm:$0xff]  ;;  %v579_v62 = vld [vmem:[%s2978_s3 + $0x100] sm:$0xff] }
  0xeb   : > { %v2454_v49 = vmax.f32 %v419_v42, 0.0  ;;  %1708 = vmatprep.subr.mxu1 %v575_v39  ;;  %1930 = vmatprep.subr.mxu0 %v592_v40  ;;  %v2470_v54 = vsel %vm510_vm4, %v520_v44, %v2443_v45  ;;  %v2487_v61 = vrot.slane %v2452_v48, 1  ;;  %v511_v16 = vrot.slane %v2494_v0, 1  ;;  %v584_v39 = vld [vmem:[%s2978_s3 + $0x128] sm:$0xff]  ;;  %v583_v42 = vld [vmem:[%s2978_s3 + $0x120] sm:$0xff]  ;;  %v550_v44 = vld [vmem:[%s2978_s3 + $0x18] sm:$0xff] }
  0xec   : > { %1918 = vmatmul.mubr.msk.f32.gmra.mxu0 %vm510_vm4, %v2398_v26  ;;  %1709 = vmatpush3.msra.mxu1 %v559_v43  ;;  %v512_v19 = vrot.slane %v2504_v4, 1  ;;  %v2570_v35 = vsel %vm473_vm2, %v2540_v23, %v484_v30  ;;  %v1587_v30 = vld [vmem:[%s2978_s3 + $0x450] sm:$0xff] }
  0xed   : > { %1931 = vmatpush3.msra.mxu0 %v592_v40  ;;  %1710 = vmatprep.subr.mxu1 %v574_v46  ;;  %v523_v60 = vrot.slane %v2454_v49, 1  ;;  %v551_v40 = vld [vmem:[%s2978_s3 + $0x20] sm:$0xff]  ;;  %v2590_v43 = vrot.slane %v2454_v49, 7  ;;  %v565_v46 = vld [vmem:[%s2978_s3 + $0x90] sm:$0xff] }
  0xee   : > { %1932 = vmatprep.subr.mxu0 %v591_v50  ;;  %1524 = vmatmul.mubr.msk.f32.gmra.mxu1 %vm2358_vm3, %v2463_v51  ;;  %v513_v21 = vsel %vm510_vm4, %v511_v16, %v512_v19  ;;  %v1591_v16 = vld [vmem:[%s2978_s3 + $0x470] sm:$0xff] }
  0xef   : > { %1711 = vmatpush3.msra.mxu1 %v558_v52  ;;  %1933 = vmatpush3.msra.mxu0 %v591_v50  ;;  %v2512_v7 = vsel %vm510_vm4, %v523_v60, %v2487_v61  ;;  %v549_v50 = vld [vmem:[%s2978_s3 + $0x10] sm:$0xff]  ;;  %v487_v52 = vrot.slane %v2452_v48, 7  ;;  %v547_v60 = vld [vmem:[%s2978_s3] sm:$0xff] }
  0xf0   : > { %723 = vmatprep.mubr.f32.mxu1 %v2365_v13  ;;  %1920 = vmatprep.mubr.f32.mxu0 %v2470_v54 }
  0xf1   : > { %1712 = vmatprep.subr.mxu1 %v573_v55  ;;  %1934 = vmatprep.subr.mxu0 %v590_v56  ;;  %v581_v55 = vld [vmem:[%s2978_s3 + $0x110] sm:$0xff]  ;;  %v2620_v57 = vsel %vm473_vm2, %v2590_v43, %v487_v52  ;;  %v1881_v52 = vpop.f32.mrf.mxu0 }
  0xf2   : > { %1921 = vmatmul.mubr.msk.f32.gmra.mxu0 %vm510_vm4, %v2443_v45  ;;  %1713 = vmatpush3.msra.mxu1 %v557_v58  ;;  %v563_v58 = vld [vmem:[%s2978_s3 + $0x80] sm:$0xff] }
  0xf3   : > { %1935 = vmatpush3.msra.mxu0 %v590_v56  ;;  %1714 = vmatprep.subr.mxu1 %v572_v63  ;;  %v548_v56 = vld [vmem:[%s2978_s3 + $0x8] sm:$0xff]  ;;  %v1576_v63 = vld [vmem:[%s2978_s3 + $0x3f8] sm:$0xff] }
  0xf4   : > { %1936 = vmatprep.subr.mxu0 %v589_v2  ;;  %724 = vmatmul.mubr.f32.gmra.mxu1 %v2508_v6 }
  0xf5   : > { %1715 = vmatpush3.msra.mxu1 %v556_v3  ;;  %1937 = vmatpush3.msra.mxu0 %v589_v2  ;;  %v474_v2 = vrot.slane %v2494_v0, 7  ;;  %v1560_v3 = vld [vmem:[%s2978_s3 + $0x378] sm:$0xff] }
  0xf6   : > { %728 = vmatprep.mubr.f32.mxu1 %v2414_v34  ;;  %1923 = vmatprep.mubr.f32.mxu0 %v2512_v7 }
  0xf7   : > { %1716 = vmatprep.subr.mxu1 %v571_v9  ;;  %1938 = vmatprep.subr.mxu0 %v588_v10  ;;  %v1575_v9 = vld [vmem:[%s2978_s3 + $0x3f0] sm:$0xff] }
  0xf8   : > { %1924 = vmatmul.mubr.msk.f32.gmra.mxu0 %vm510_vm4, %v2487_v61  ;;  %1717 = vmatpush3.msra.mxu1 %v555_v14  ;;  %v1574_v14 = vld [vmem:[%s2978_s3 + $0x3e8] sm:$0xff] }
  0xf9   : > { %1939 = vmatpush3.msra.mxu0 %v588_v10  ;;  %1718 = vmatprep.subr.mxu1 %v570_v17  ;;  %v1559_v10 = vld [vmem:[%s2978_s3 + $0x370] sm:$0xff]  ;;  %v475_v17 = vrot.slane %v2504_v4, 7 }
  0xfa   : > { %1940 = vmatprep.subr.mxu0 %v587_v18  ;;  %1958 = vmatprep.mubr.f32.mxu0 %v513_v21  ;;  %v1573_v21 = vld [vmem:[%s2978_s3 + $0x3e0] sm:$0xff] }
  0xfb   : > { %1526 = vmatmul.mubr.msk.f32.gmra.mxu1 %vm2358_vm3, %v2540_v23  ;;  %1941 = vmatpush3.msra.mxu0 %v587_v18  ;;  %v1558_v18 = vld [vmem:[%s2978_s3 + $0x368] sm:$0xff] }
  0xfc   : > { %1719 = vmatpush3.msra.mxu1 %v554_v24  ;;  %733 = vmatprep.mubr.f32.mxu1 %v2400_v27  ;;  %v1572_v24 = vld [vmem:[%s2978_s3 + $0x3d8] sm:$0xff] }
  0xfd   : > { %1720 = vmatprep.subr.mxu1 %v569_v25  ;;  %1942 = vmatprep.subr.mxu0 %v586_v28  ;;  %v1589_v25 = vld [vmem:[%s2978_s3 + $0x460] sm:$0xff] }
  0xfe   : > { %1721 = vmatpush3.msra.mxu1 %v553_v29  ;;  %1943 = vmatpush3.msra.mxu0 %v586_v28  ;;  %v1588_v28 = vld [vmem:[%s2978_s3 + $0x458] sm:$0xff]  ;;  %v1555_v29 = vld [vmem:[%s2978_s3 + $0x350] sm:$0xff] }
  0xff   : > { %1722 = vmatprep.subr.mxu1 %v568_v31  ;;  %1944 = vmatprep.subr.mxu0 %v585_v32  ;;  %v1569_v31 = vld [vmem:[%s2978_s3 + $0x3c0] sm:$0xff] }
 0x100   : > { %734 = vmatmul.mubr.f32.gmra.mxu1 %v2570_v35  ;;  %1945 = vmatpush3.msra.mxu0 %v585_v32  ;;  %v1586_v32 = vld [vmem:[%s2978_s3 + $0x448] sm:$0xff] }
 0x101   : > { %1723 = vmatpush3.msra.mxu1 %v552_v33  ;;  %738 = vmatprep.mubr.f32.mxu1 %v2454_v49  ;;  %v1553_v33 = vld [vmem:[%s2978_s3 + $0x340] sm:$0xff] }
 0x102   : > { %1724 = vmatprep.subr.mxu1 %v567_v38  ;;  %1946 = vmatprep.subr.mxu0 %v584_v39  ;;  %v1585_v38 = vld [vmem:[%s2978_s3 + $0x440] sm:$0xff] }
 0x103   : > { %1725 = vmatpush3.msra.mxu1 %v551_v40  ;;  %1947 = vmatpush3.msra.mxu0 %v584_v39  ;;  %v1552_v39 = vld [vmem:[%s2978_s3 + $0x338] sm:$0xff]  ;;  %v1567_v40 = vld [vmem:[%s2978_s3 + $0x3b0] sm:$0xff] }
 0x104   : > { %1726 = vmatprep.subr.mxu1 %v566_v41  ;;  %1948 = vmatprep.subr.mxu0 %v583_v42  ;;  %v1584_v41 = vld [vmem:[%s2978_s3 + $0x438] sm:$0xff] }
 0x105   : > { %1528 = vmatmul.mubr.msk.f32.gmra.mxu1 %vm2358_vm3, %v2590_v43  ;;  %1949 = vmatpush3.msra.mxu0 %v583_v42  ;;  %v1566_v42 = vld [vmem:[%s2978_s3 + $0x3a8] sm:$0xff] }
 0x106   : > { %1727 = vmatpush3.msra.mxu1 %v550_v44  ;;  %743 = vmatprep.mubr.f32.mxu1 %v2452_v48  ;;  %v1583_v44 = vld [vmem:[%s2978_s3 + $0x430] sm:$0xff] }
 0x107   : > { %1728 = vmatprep.subr.mxu1 %v565_v46  ;;  %1950 = vmatprep.subr.mxu0 %v582_v47  ;;  %v1550_v46 = vld [vmem:[%s2978_s3 + $0x328] sm:$0xff] }
 0x108   : > { %1729 = vmatpush3.msra.mxu1 %v549_v50  ;;  %1951 = vmatpush3.msra.mxu0 %v582_v47  ;;  %v1565_v47 = vld [vmem:[%s2978_s3 + $0x3a0] sm:$0xff]  ;;  %v1582_v50 = vld [vmem:[%s2978_s3 + $0x428] sm:$0xff] }
 0x109   : > { %1730 = vmatprep.subr.mxu1 %v564_v53  ;;  %1952 = vmatprep.subr.mxu0 %v581_v55  ;;  %v1549_v53 = vld [vmem:[%s2978_s3 + $0x320] sm:$0xff] }
 0x10a   : > { %744 = vmatmul.mubr.f32.gmra.mxu1 %v2620_v57  ;;  %1953 = vmatpush3.msra.mxu0 %v581_v55  ;;  %v1564_v55 = vld [vmem:[%s2978_s3 + $0x398] sm:$0xff] }
 0x10b   : > { %1731 = vmatpush3.msra.mxu1 %v548_v56  ;;  %918 = vmatprep.mubr.f32.mxu1 %v2494_v0  ;;  %v1592_v0 = vld [vmem:[%s2978_s3 + $0x478] sm:$0xff]  ;;  %v1581_v56 = vld [vmem:[%s2978_s3 + $0x420] sm:$0xff] }
 0x10c   : > { %1732 = vmatprep.subr.mxu1 %v563_v58  ;;  %1954 = vmatprep.subr.mxu0 %v580_v59  ;;  %v1548_v58 = vld [vmem:[%s2978_s3 + $0x318] sm:$0xff] }
 0x10d   : > { %1733 = vmatpush3.msra.mxu1 %v547_v60  ;;  %1955 = vmatpush3.msra.mxu0 %v580_v59  ;;  %v428_v59 = vpop.f32.mrf.mxu0  ;;  %v1563_v60 = vld [vmem:[%s2978_s3 + $0x390] sm:$0xff] }
 0x10e   : > { %1956 = vmatprep.subr.mxu0 %v579_v62  ;;  %1782 = vmatprep.subr.mxu1 %v1576_v63  ;;  %v1547_v63 = vld [vmem:[%s2978_s3 + $0x310] sm:$0xff] }
 0x10f   : > { %1534 = vmatmul.mubr.msk.f32.vlgmr.msra.gmra.mxu1 %vm2358_vm3, %v474_v2  ;;  %1957 = vmatpush3.msra.mxu0 %v579_v62  ;;  %v1580_v62 = vld [vmem:[%s2978_s3 + $0x418] sm:$0xff] }
 0x110   : > { %1783 = vmatpush3.msra.mxu1 %v1560_v3  ;;  %923 = vmatprep.mubr.f32.mxu1 %v2504_v4  ;;  %v1557_v4 = vld [vmem:[%s2978_s3 + $0x360] sm:$0xff]  ;;  %v1579_v3 = vld [vmem:[%s2978_s3 + $0x410] sm:$0xff] }
 0x111   : > { %1959 = vmatmul.mubr.msk.f32.vlgmr.msra.gmra.mxu0 %vm510_vm4, %v512_v19  ;;  %1784 = vmatprep.subr.mxu1 %v1575_v9  ;;  %v476_v19 = vsel %vm473_vm2, %v474_v2, %v475_v17  ;;  %v1562_v2 = vld [vmem:[%s2978_s3 + $0x388] sm:$0xff]  ;;  %v434_v9 = vadd.f32 %v1881_v52, %v2348_v1 }
 0x112   : > { %1970 = vmatprep.subr.mxu0 %v1592_v0  ;;  %1961 = vmatprep.mubr.f32.mxu0 %v2387_v22  ;;  %v1590_v22 = vld [vmem:[%s2978_s3 + $0x468] sm:$0xff] }
 0x113   : > { %1785 = vmatpush3.msra.mxu1 %v1559_v10  ;;  %1971 = vmatpush3.msra.mxu0 %v1592_v0  ;;  %v429_v0 = vadd.f32 %v2348_v1, %v428_v59  ;;  %v1546_v10 = vld [vmem:[%s2978_s3 + $0x308] sm:$0xff]  ;;  %v1545_v1 = vld [vmem:[%s2978_s3 + $0x300] sm:$0xff]  ;;  %v448_v17 = vmax.f32 %v434_v9, 0.0 }
 0x114   : > { %1786 = vmatprep.subr.mxu1 %v1574_v14  ;;  %1972 = vmatprep.subr.mxu0 %v1591_v16  ;;  %v1561_v14 = vld [vmem:[%s2978_s3 + $0x380] sm:$0xff] }
 0x115   : > { %924 = vmatmul.mubr.f32.gmra.mxu1 %v476_v19  ;;  %1973 = vmatpush3.msra.mxu0 %v1591_v16  ;;  %v1578_v16 = vld [vmem:[%s2978_s3 + $0x408] sm:$0xff]  ;;  %v1577_v19 = vld [vmem:[%s2978_s3 + $0x400] sm:$0xff] }
 0x116   : > { %1787 = vmatpush3.msra.mxu1 %v1558_v18  ;;  %928 = vmatprep.mubr.f32.mxu1 %v2354_v8  ;;  %v1556_v8 = vld [vmem:[%s2978_s3 + $0x358] sm:$0xff]  ;;  %v447_v18 = vmax.f32 %v429_v0, 0.0 }
 0x117   : > { %1962 = vmatmul.mubr.msk.f32.gmra.mxu0 %vm510_vm4, %v2363_v12  ;;  %1788 = vmatprep.subr.mxu1 %v1573_v21  ;;  %v1571_v12 = vld [vmem:[%s2978_s3 + $0x3d0] sm:$0xff]  ;;  %v458_v21 = vstv %s454_s29 }
 0x118   : > { %1974 = vmatprep.subr.mxu0 %v1590_v22  ;;  %1964 = vmatprep.mubr.f32.mxu0 %v2423_v37 }
 0x119   : > { %1789 = vmatpush3.msra.mxu1 %v1557_v4  ;;  %1975 = vmatpush3.msra.mxu0 %v1590_v22  ;;  %v460_v22 = vmul.f32 %v458_v21, %v448_v17  ;;  %v459_v4 = vmul.f32 %v458_v21, %v447_v18 }
 0x11a   : > { %1790 = vmatprep.subr.mxu1 %v1572_v24  ;;  %1976 = vmatprep.subr.mxu0 %v1589_v25 }
 0x11b   : > { %1536 = vmatmul.mubr.msk.f32.gmra.mxu1 %vm2358_vm3, %v2370_v15  ;;  %1977 = vmatpush3.msra.mxu0 %v1589_v25  ;;  %v1570_v15 = vld [vmem:[%s2978_s3 + $0x3c8] sm:$0xff]  ;;  %v527_v24 = vrot.slane %v460_v22, 1 }
 0x11c   : > { %1791 = vmatpush3.msra.mxu1 %v1556_v8  ;;  %933 = vmatprep.mubr.f32.mxu1 %v2351_v5  ;;  %v1554_v5 = vld [vmem:[%s2978_s3 + $0x348] sm:$0xff] }
 0x11d   : > { %1965 = vmatmul.mubr.msk.f32.gmra.mxu0 %vm510_vm4, %v2398_v26  ;;  %1792 = vmatprep.subr.mxu1 %v1571_v12 }
 0x11e   : > { %1978 = vmatprep.subr.mxu0 %v1588_v28  ;;  %1967 = vmatprep.mubr.f32.mxu0 %v2470_v54 }
 0x11f   : > { %1793 = vmatpush3.msra.mxu1 %v1555_v29  ;;  %1979 = vmatpush3.msra.mxu0 %v1588_v28 }
 0x120   : > { %1794 = vmatprep.subr.mxu1 %v1570_v15  ;;  %1980 = vmatprep.subr.mxu0 %v1587_v30 }
 0x121   : > { %934 = vmatmul.mubr.f32.gmra.mxu1 %v2419_v36  ;;  %1981 = vmatpush3.msra.mxu0 %v1587_v30  ;;  %v1568_v36 = vld [vmem:[%s2978_s3 + $0x3b8] sm:$0xff] }
 0x122   : > { %1795 = vmatpush3.msra.mxu1 %v1554_v5  ;;  %938 = vmatprep.mubr.f32.mxu1 %v2379_v20 }
 0x123   : > { %1968 = vmatmul.mubr.msk.f32.gmra.mxu0 %vm510_vm4, %v2443_v45  ;;  %1796 = vmatprep.subr.mxu1 %v1569_v31 }
 0x124   : > { %1982 = vmatprep.subr.mxu0 %v1586_v32  ;;  %1797 = vmatpush3.msra.mxu1 %v1553_v33 }
 0x125   : > { %1983 = vmatpush3.msra.mxu0 %v1586_v32  ;;  %2002 = vmatprep.mubr.f32.mxu0 %v2423_v37  ;;  %v1551_v37 = vld [vmem:[%s2978_s3 + $0x330] sm:$0xff] }
 0x126   : > { %1798 = vmatprep.subr.mxu1 %v1568_v36  ;;  %1984 = vmatprep.subr.mxu0 %v1585_v38 }
 0x127   : > { %1538 = vmatmul.mubr.msk.f32.gmra.mxu1 %vm2358_vm3, %v2463_v51  ;;  %1985 = vmatpush3.msra.mxu0 %v1585_v38 }
 0x128   : > { %1799 = vmatpush3.msra.mxu1 %v1552_v39  ;;  %943 = vmatprep.mubr.f32.mxu1 %v2365_v13 }
 0x129   : > { %1800 = vmatprep.subr.mxu1 %v1567_v40  ;;  %1986 = vmatprep.subr.mxu0 %v1584_v41 }
 0x12a   : > { %1801 = vmatpush3.msra.mxu1 %v1551_v37  ;;  %1987 = vmatpush3.msra.mxu0 %v1584_v41 }
 0x12b   : > { %1802 = vmatprep.subr.mxu1 %v1566_v42  ;;  %1988 = vmatprep.subr.mxu0 %v1583_v44 }
 0x12c   : > { %944 = vmatmul.mubr.f32.gmra.mxu1 %v2508_v6  ;;  %1989 = vmatpush3.msra.mxu0 %v1583_v44 }
 0x12d   : > { %1803 = vmatpush3.msra.mxu1 %v1550_v46  ;;  %948 = vmatprep.mubr.f32.mxu1 %v2414_v34 }
 0x12e   : > { %1804 = vmatprep.subr.mxu1 %v1565_v47  ;;  %1990 = vmatprep.subr.mxu0 %v1582_v50 }
 0x12f   : > { %1805 = vmatpush3.msra.mxu1 %v1549_v53  ;;  %1991 = vmatpush3.msra.mxu0 %v1582_v50 }
 0x130   : > { %1806 = vmatprep.subr.mxu1 %v1564_v55  ;;  %1992 = vmatprep.subr.mxu0 %v1581_v56 }
 0x131   : > { %1540 = vmatmul.mubr.msk.f32.gmra.mxu1 %vm2358_vm3, %v2540_v23  ;;  %1993 = vmatpush3.msra.mxu0 %v1581_v56 }
 0x132   : > { %1807 = vmatpush3.msra.mxu1 %v1548_v58  ;;  %953 = vmatprep.mubr.f32.mxu1 %v2400_v27 }
 0x133   : > { %1808 = vmatprep.subr.mxu1 %v1563_v60  ;;  %1994 = vmatprep.subr.mxu0 %v1580_v62 }
 0x134   : > { %1809 = vmatpush3.msra.mxu1 %v1547_v63  ;;  %1995 = vmatpush3.msra.mxu0 %v1580_v62 }
 0x135   : > { %1810 = vmatprep.subr.mxu1 %v1562_v2  ;;  %1996 = vmatprep.subr.mxu0 %v1579_v3 }
 0x136   : > { %954 = vmatmul.mubr.f32.gmra.mxu1 %v2570_v35  ;;  %1997 = vmatpush3.msra.mxu0 %v1579_v3 }
 0x137   : > { %1811 = vmatpush3.msra.mxu1 %v1546_v10  ;;  %1177 = vmatprep.mubr.f32.mxu1 %v2379_v20  ;;  %v526_v20 = vrot.slane %v459_v4, 1 }
 0x138   : > { %1812 = vmatprep.subr.mxu1 %v1561_v14  ;;  %1998 = vmatprep.subr.mxu0 %v1578_v16 }
 0x139   : > { %1813 = vmatpush3.msra.mxu1 %v1545_v1  ;;  %1999 = vmatpush3.msra.mxu0 %v1578_v16 }
 0x13a   : > { %2000 = vmatprep.subr.mxu0 %v1577_v19  ;;  %1594 = vmatmul.mubr.msk.f32.vlgmr.msra.gmra.mxu1 %vm2358_vm3, %v2463_v51 }
 0x13b   : > { %2001 = vmatpush3.msra.mxu0 %v1577_v19  ;;  %1182 = vmatprep.mubr.f32.mxu1 %v2365_v13  ;;  %v528_v13 = vsel %vm510_vm4, %v526_v20, %v527_v24 }
 0x13c   : > { %2003 = vmatmul.mubr.msk.f32.vlgmr.msra.gmra.mxu0 %vm510_vm4, %v2398_v26  ;;  %v489_v26 = vrot.slane %v459_v4, 7 }
 0x13d   : > { %2005 = vmatprep.mubr.f32.mxu0 %v2470_v54 }
 0x13e   : > { %1183 = vmatmul.mubr.f32.gmra.mxu1 %v2508_v6 }
 0x13f   : > { %1187 = vmatprep.mubr.f32.mxu1 %v2414_v34 }
 0x140   : > { %2006 = vmatmul.mubr.msk.f32.gmra.mxu0 %vm510_vm4, %v2443_v45 }
 0x141   : > { %2008 = vmatprep.mubr.f32.mxu0 %v2512_v7 }
 0x142   : > { %1596 = vmatmul.mubr.msk.f32.gmra.mxu1 %vm2358_vm3, %v2540_v23 }
 0x143   : > { %1192 = vmatprep.mubr.f32.mxu1 %v2400_v27  ;;  %v490_v27 = vrot.slane %v460_v22, 7 }
 0x144   : > { %2009 = vmatmul.mubr.msk.f32.gmra.mxu0 %vm510_vm4, %v2487_v61 }
 0x145   : > { %2011 = vmatprep.mubr.f32.mxu0 %v528_v13  ;;  %v491_v34 = vsel %vm473_vm2, %v489_v26, %v490_v27 }
 0x146   : > { %1193 = vmatmul.mubr.f32.gmra.mxu1 %v2570_v35 }
 0x147   : > { %1197 = vmatprep.mubr.f32.mxu1 %v2454_v49 }
 0x148   : > { %2012 = vmatmul.mubr.msk.f32.gmra.mxu0 %vm510_vm4, %v527_v24 }
 0x14a   : > { %1598 = vmatmul.mubr.msk.f32.gmra.mxu1 %vm2358_vm3, %v2590_v43 }
 0x14b   : > { %1202 = vmatprep.mubr.f32.mxu1 %v2452_v48 }
 0x14e   : > { %1203 = vmatmul.mubr.f32.gmra.mxu1 %v2620_v57 }
 0x14f   : > { %1207 = vmatprep.mubr.f32.mxu1 %v459_v4 }
 0x152   : > { %1600 = vmatmul.mubr.msk.f32.gmra.mxu1 %vm2358_vm3, %v489_v26 }
 0x153   : > { %1212 = vmatprep.mubr.f32.mxu1 %v460_v22 }
 0x156   : > { %1213 = vmatmul.mubr.f32.gmra.mxu1 %v491_v34 }
 0x1a3   : > { %v1654_v45 = vpop.f32.mrf.mxu1 }
 0x1a5   : > { %v1655_v49 = vpop.f32.mrf.mxu1 }
 0x1a6   : > { %v1916_v57 = vpop.f32.mrf.mxu0  ;;  %v1656_v2 = vadd.f32 %v1655_v49, %v1654_v45 }
 0x1a8   : > { %v1657_v51 = vpop.f32.mrf.mxu1  ;;  %v815_v12 = vpop.f32.mrf.mxu0 }
 0x1a9   : > { %v816_v14 = vadd.f32 %v1656_v2, %v815_v12  ;;  %v2913_v12 = vld [vmem:[%s2979_s4] ss:$0 sm:$0xff] }
 0x1aa   : > { %v1658_v54 = vpop.f32.mrf.mxu1 }
 0x1ab   : > { %v1659_v16 = vadd.f32 %v1658_v54, %v1657_v51 }
 0x1ac   : > { %v2872_v29 = vpop.f32.mrf.mxu0 }
 0x1ad   : > { %v821_v20 = vadd.f32 %v1916_v57, %v1659_v16 }
 0x1ae   : > { %v1660_v61 = vpop.f32.mrf.mxu1  ;;  %v825_v5 = vpop.f32.mrf.mxu0 }
 0x1b0   : > { %v1661_v6 = vpop.f32.mrf.mxu1 }
 0x1b1   : > { %v1662_v21 = vadd.f32 %v1661_v6, %v1660_v61 }
 0x1b2   : > { %v2876_v32 = vpop.f32.mrf.mxu0 }
 0x1b3   : > { %v826_v51 = vadd.f32 %v1662_v21, %v825_v5 }
 0x1b4   : > { %v2854_v7 = vpop.f32.mrf.mxu1  ;;  %v2878_v36 = vpop.f32.mrf.mxu0 }
 0x1b6   : > { %v2856_v48 = vpop.f32.mrf.mxu1 }
 0x1b7   : > { %v1665_v54 = vadd.f32 %v2856_v48, %v2854_v7 }
 0x1b8   : > { %v2880_v39 = vpop.f32.mrf.mxu0 }
 0x1ba   : > { %v2882_v41 = vpop.f32.mrf.mxu0 }
 0x1bb   : > { %v2858_v23 = vpop.f32.mrf.mxu1 }
 0x1bd   : > { %v2860_v35 = vpop.f32.mrf.mxu1 }
 0x1be   : > { %v1668_v48 = vadd.f32 %v2860_v35, %v2858_v23 }
 0x1c0   : > { %v2862_v11 = vpop.f32.mrf.mxu1 }
 0x1c2   : > { %v2864_v43 = vpop.f32.mrf.mxu1 }
 0x1c5   : > { %v2866_v25 = vpop.f32.mrf.mxu1 }
 0x1c7   : > { %v2868_v8 = vpop.f32.mrf.mxu1 }
 0x1ca   : > { %v2870_v28 = vpop.f32.mrf.mxu1 }
 0x1cc   : > { %v2874_v15 = vpop.f32.mrf.mxu1 }
 0x1cf   : > { %v1734_v30 = vpop.f32.mrf.mxu1 }
 0x1d1   : > { %v1735_v31 = vpop.f32.mrf.mxu1  ;;  %v1960_v42 = vpop.f32.mrf.mxu0 }
 0x1d2   : > { %v1736_v0 = vadd.f32 %v1735_v31, %v1734_v30 }
 0x1d3   : > { %v1025_v46 = vpop.f32.mrf.mxu0 }
 0x1d4   : > { %v921_v18 = vadd.f32 %v1736_v0, %v816_v14 }
 0x1d5   : > { %v1737_v33 = vpop.f32.mrf.mxu1 }
 0x1d6   : > { %v1026_v34 = vadd.f32 %v1025_v46, %v921_v18  ;;  %v831_v46 = vadd.f32 %v2872_v29, %v1665_v54 }
 0x1d7   : > { %v1738_v38 = vpop.f32.mrf.mxu1  ;;  %v2884_v50 = vpop.f32.mrf.mxu0 }
 0x1d8   : > { %v1739_v19 = vadd.f32 %v1738_v38, %v1737_v33 }
 0x1d9   : > { %v1035_v55 = vpop.f32.mrf.mxu0 }
 0x1da   : > { %v926_v45 = vadd.f32 %v1739_v19, %v821_v20  ;;  %v1671_v19 = vadd.f32 %v2864_v43, %v2862_v11  ;;  %v1674_v43 = vadd.f32 %v2868_v8, %v2866_v25  ;;  %v1677_v8 = vadd.f32 %v2874_v15, %v2870_v28 }
 0x1db   : > { %v1740_v40 = vpop.f32.mrf.mxu1 }
 0x1dc   : > { %v1031_v38 = vadd.f32 %v1960_v42, %v926_v45  ;;  %v841_v11 = vadd.f32 %v2876_v32, %v1671_v19 }
 0x1dd   : > { %v1741_v37 = vpop.f32.mrf.mxu1  ;;  %v2888_v58 = vpop.f32.mrf.mxu0 }
 0x1de   : > { %v1742_v13 = vadd.f32 %v1741_v37, %v1740_v40 }
 0x1df   : > { %v2894_v62 = vpop.f32.mrf.mxu0 }
 0x1e0   : > { %v931_v30 = vadd.f32 %v1742_v13, %v826_v51 }
 0x1e1   : > { %v1743_v44 = vpop.f32.mrf.mxu1 }
 0x1e2   : > { %v1036_v42 = vadd.f32 %v1035_v55, %v931_v30 }
 0x1e3   : > { %v1744_v47 = vpop.f32.mrf.mxu1  ;;  %v2899_v3 = vpop.f32.mrf.mxu0 }
 0x1e4   : > { %v1745_v40 = vadd.f32 %v1744_v47, %v1743_v44 }
 0x1e5   : > { %v2905_v1 = vpop.f32.mrf.mxu0 }
 0x1e6   : > { %v936_v16 = vadd.f32 %v1745_v40, %v831_v46 }
 0x1e7   : > { %v1746_v52 = vpop.f32.mrf.mxu1 }
 0x1e9   : > { %v1747_v53 = vpop.f32.mrf.mxu1 }
 0x1ec   : > { %v2886_v56 = vpop.f32.mrf.mxu1 }
 0x1ee   : > { %v2890_v59 = vpop.f32.mrf.mxu1 }
 0x1ef   : > { %v1751_v55 = vadd.f32 %v2890_v59, %v2886_v56 }
 0x1f1   : > { %v2892_v60 = vpop.f32.mrf.mxu1  ;;  %v946_v56 = vadd.f32 %v1751_v55, %v841_v11 }
 0x1f3   : > { %v2896_v63 = vpop.f32.mrf.mxu1 }
 0x1f4   : > { %v1754_v51 = vadd.f32 %v2896_v63, %v2892_v60 }
 0x1f6   : > { %v2901_v9 = vpop.f32.mrf.mxu1 }
 0x1f8   : > { %v2903_v10 = vpop.f32.mrf.mxu1 }
 0x1f9   : > { %v1757_v60 = vadd.f32 %v2903_v10, %v2901_v9 }
 0x1fa   : > { %v1814_v17 = vpop.f32.mrf.mxu1 }
 0x1fc   : > { %v2004_v22 = vpop.f32.mrf.mxu0  ;;  %v1815_v4 = vpop.f32.mrf.mxu1 }
 0x1fd   : > { %v1816_v24 = vadd.f32 %v1815_v4, %v1814_v17  ;;  %v1748_v17 = vadd.f32 %v1747_v53, %v1746_v52  ;;  %v1041_v52 = vadd.f32 %v2884_v50, %v936_v16 }
 0x1fe   : > { %v1284_v26 = vpop.f32.mrf.mxu0  ;;  %v1817_v27 = vpop.f32.mrf.mxu1 }
 0x1ff   : > { %v1285_v49 = vadd.f32 %v1816_v24, %v1284_v26 }
 0x200   : > { %v1818_v61 = vpop.f32.mrf.mxu1  ;;  %v2007_v31 = vpop.f32.mrf.mxu0 }
 0x201   : > { %v1323_v6 = vadd.f32 %v1285_v49, %v1026_v34  ;;  %v1819_v57 = vadd.f32 %v1818_v61, %v1817_v27  ;;  %v846_v61 = vadd.f32 %v1674_v43, %v2882_v41 }
 0x202   : > { %v1820_v33 = vpop.f32.mrf.mxu1  ;;  %v1294_v44 = vpop.f32.mrf.mxu0 }
 0x203   : > { %v1338_v37 = vadd.f32 %v2913_v12, %v1323_v6  ;;  %v1290_v5 = vadd.f32 %v2004_v22, %v1819_v57  ;;  %v836_v22 = vadd.f32 %v1668_v48, %v2878_v36 }
 0x204   : > { %v1821_v7 = vpop.f32.mrf.mxu1  ;;  %v2010_v20 = vpop.f32.mrf.mxu0 }
 0x205   : > { %v1346_v2 = vmax.f32 %v1338_v37, 0.0  ;;  %v1324_v0 = vadd.f32 %v1290_v5, %v1031_v38  ;;  %v1822_v14 = vadd.f32 %v1821_v7, %v1820_v33  ;;  %v941_v53 = vadd.f32 %v1748_v17, %v836_v22 }
 0x206   : > { %v1823_v47 = vpop.f32.mrf.mxu1  ;;  %v1304_v59 = vpop.f32.mrf.mxu0  ;;  %v951_v38 = vadd.f32 %v1754_v51, %v846_v61  ;;  %v851_v37 = vadd.f32 %v2880_v39, %v1677_v8 }
 0x207   : > { %1354 = vst [vmem:[%s2920_s28] sm:$0xff] %v1346_v2  ;;  %v1339_v29 = vadd.f32 %v2913_v12, %v1324_v0  ;;  %v1295_v18 = vadd.f32 %v1822_v14, %v1294_v44  ;;  %v1046_v50 = vadd.f32 %v2894_v62, %v941_v53 }
 0x208   : > { %v1824_v21 = vpop.f32.mrf.mxu1  ;;  %v2013_v62 = vpop.f32.mrf.mxu0  ;;  %v1056_v7 = vadd.f32 %v2905_v1, %v951_v38  ;;  %v956_v48 = vadd.f32 %v1757_v60, %v851_v37 }
 0x209   : > { %v1347_v23 = vmax.f32 %v1339_v29, 0.0  ;;  %v1325_v35 = vadd.f32 %v1295_v18, %v1036_v42  ;;  %v1825_v4 = vadd.f32 %v1824_v21, %v1823_v47 }
 0x20a   : > { %v1826_v24 = vpop.f32.mrf.mxu1  ;;  %v1314_v46 = vpop.f32.mrf.mxu0  ;;  %v1061_v39 = vadd.f32 %v2899_v3, %v956_v48 }
 0x20b   : > { %1355 = vst [vmem:[%s2920_s28 + $0x8] sm:$0xff] %v1347_v23  ;;  %v1340_v13 = vadd.f32 %v2913_v12, %v1325_v35  ;;  %v1300_v26 = vadd.f32 %v2007_v31, %v1825_v4  ;;  %v1051_v31 = vadd.f32 %v2888_v58, %v946_v56 }
 0x20c   : > { %v1827_v36 = vpop.f32.mrf.mxu1 }
 0x20d   : > { %v1348_v27 = vmax.f32 %v1340_v13, 0.0  ;;  %v1326_v34 = vadd.f32 %v1300_v26, %v1041_v52  ;;  %v1828_v45 = vadd.f32 %v1827_v36, %v1826_v24 }
 0x20e   : > { %v1829_v49 = vpop.f32.mrf.mxu1 }
 0x20f   : > { %1356 = vst [vmem:[%s2920_s28 + $0x10] sm:$0xff] %v1348_v27  ;;  %v1341_v54 = vadd.f32 %v2913_v12, %v1326_v34  ;;  %v1305_v32 = vadd.f32 %v1828_v45, %v1304_v59 }
 0x210   : > { %v1830_v25 = vpop.f32.mrf.mxu1 }
 0x211   : > { %v1349_v6 = vmax.f32 %v1341_v54, 0.0  ;;  %v1327_v57 = vadd.f32 %v1305_v32, %v1046_v50  ;;  %v1831_v30 = vadd.f32 %v1830_v25, %v1829_v49 }
 0x212   : > { %v1832_v33 = vpop.f32.mrf.mxu1 }
 0x213   : > { %1357 = vst [vmem:[%s2920_s28 + $0x18] sm:$0xff] %v1349_v6  ;;  %v1342_v63 = vadd.f32 %v2913_v12, %v1327_v57  ;;  %v1310_v41 = vadd.f32 %v2010_v20, %v1831_v30 }
 0x214   : > { %v1833_v40 = vpop.f32.mrf.mxu1 }
 0x215   : > { %v1350_v28 = vmax.f32 %v1342_v63, 0.0  ;;  %v1328_v15 = vadd.f32 %v1310_v41, %v1051_v31  ;;  %v1834_v5 = vadd.f32 %v1833_v40, %v1832_v33 }
 0x216   : > { %v1835_v58 = vpop.f32.mrf.mxu1 }
 0x217   : > { %1358 = vst [vmem:[%s2920_s28 + $0x20] sm:$0xff] %v1350_v28  ;;  %v1343_v9 = vadd.f32 %v2913_v12, %v1328_v15  ;;  %v1315_v10 = vadd.f32 %v1834_v5, %v1314_v46 }
 0x218   : > { %v1836_v2 = vpop.f32.mrf.mxu1 }
 0x219   : > { %v1351_v0 = vmax.f32 %v1343_v9, 0.0  ;;  %v1329_v14 = vadd.f32 %v1315_v10, %v1056_v7  ;;  %v1837_v42 = vadd.f32 %v1836_v2, %v1835_v58 }
 0x21b   : > { %1359 = vst [vmem:[%s2920_s28 + $0x28] sm:$0xff] %v1351_v0  ;;  %v1344_v44 = vadd.f32 %v2913_v12, %v1329_v14  ;;  %v1320_v47 = vadd.f32 %v2013_v62, %v1837_v42 }
 0x21d   : > { %v1352_v16 = vmax.f32 %v1344_v44, 0.0  ;;  %v1330_v17 = vadd.f32 %v1320_v47, %v1061_v39 }
 0x21f   : > { %1360 = vst [vmem:[%s2920_s28 + $0x30] sm:$0xff] %v1352_v16  ;;  %v1345_v1 = vadd.f32 %v2913_v12, %v1330_v17 }
 0x221   : > { %v1353_v29 = vmax.f32 %v1345_v1, 0.0 }
 0x223   : > { %1361 = vst [vmem:[%s2920_s28 + $0x38] sm:$0xff] %v1353_v29 }
 0x224 PF: > { %s15_s22 = sadd.s32 1, %s2093_s22   ;;  %s2983_s18 = smov %s2085_s20 }
 0x225   : > { %p12_p9 = scmp.ge.s32.totalorder %s15_s22, 10   ;;  %s2984_s19 = smov %s2089_s21 }
 0x226   : > { %s2985_s20 = smov %s2988_s23  ;;  %s2986_s21 = smov %s2992_s24 }
 0x227   :  { %14 = sbr.rel (!%p12_p9) target bundleno = 3 (0x3), region = 73 }

</bundles_post_ra>
